<compile_context>
chip_gen: v5e
topology: v5e:2x2
jax: 0.10.0
libtpu: 0.0.40
codegen_flags: <defaults>
</compile_context>

<pallas_src>
import functools

import jax
import jax.numpy as jnp
from jax.experimental import pallas as pl
from jax.experimental.pallas import tpu as pltpu


# bf16 MXU inputs (2-4x MXU throughput on v5e/v6e/v7x, half the weight DMA bytes);
# accumulation stays f32 via preferred_element_type.
MXU_IN_DTYPE = jnp.bfloat16


# ----------------------------- in-kernel helpers -----------------------------

def _mm(a, b):
    return jnp.dot(a.astype(MXU_IN_DTYPE), b.astype(MXU_IN_DTYPE),
                   preferred_element_type=jnp.float32)


def _mm_nt(a, b):
    # a @ b.T without materializing the transpose.
    return jax.lax.dot_general(a.astype(MXU_IN_DTYPE), b.astype(MXU_IN_DTYPE),
                               (((1,), (1,)), ((), ())),
                               preferred_element_type=jnp.float32)


def _layernorm(x, g, b):
    # PyTorch LayerNorm semantics: biased variance, eps=1e-5, affine. g/b: (1, D). f32 math.
    mu = jnp.mean(x, axis=-1, keepdims=True)
    var = jnp.mean((x - mu) ** 2, axis=-1, keepdims=True)
    return (x - mu) * jax.lax.rsqrt(var + 1e-5) * g + b


def _erf(x):
    # Abramowitz & Stegun 7.1.26 (|error| < 1.5e-7); exp + elementwise only (Mosaic-safe).
    a1, a2, a3, a4, a5 = 0.254829592, -0.284496736, 1.421413741, -1.453152027, 1.061405429
    p = 0.3275911
    s = jnp.where(x >= 0.0, 1.0, -1.0)
    z = jnp.abs(x)
    t = 1.0 / (1.0 + p * z)
    poly = ((((a5 * t + a4) * t + a3) * t + a2) * t + a1) * t
    return s * (1.0 - poly * jnp.exp(-z * z))


def _gelu_exact(x):
    # nn.GELU() default = exact erf GELU.
    return 0.5 * x * (1.0 + _erf(x * 0.7071067811865476))


# ----------------------------- Pallas kernels -----------------------------

def _input_stage_kernel(xp_ref, emb_ref, pw_ref, lnw_ref, lnb_ref, w1_ref, w2_ref,
                        o_ref, *, bt, num_latents, per_latent):
    # latent = emb + input_proj(x); latent += FFN(LN(latent))
    # The whole batch tile is flattened to a (Bt*L, D) slab so projection + FFN matmuls
    # are lane-dense and fill the MXU M dimension.
    emb = emb_ref[...]                                    # (L, D)
    d = emb.shape[1]
    if per_latent:
        rows = xp_ref[...].reshape(bt * num_latents, d)   # (Bt*L, D)
        proj = _mm(rows, pw_ref[...])
        latent = emb[None, :, :] + proj.reshape(bt, num_latents, d)
    else:
        proj = _mm(xp_ref[...], pw_ref[...])              # (Bt, D)
        latent = emb[None, :, :] + proj[:, None, :]       # (Bt, L, D)
    lat2 = latent.reshape(bt * num_latents, d)
    h = _layernorm(lat2, lnw_ref[...], lnb_ref[...])
    h = _gelu_exact(_mm(h, w1_ref[...]))
    o_ref[...] = (lat2 + _mm(h, w2_ref[...])).reshape(bt, num_latents, d)


def _block_cross_kernel(x_ref, ctx_ref, *rest, heads, has_mask, emit_attn, final_ln):
    # Full pre-norm transformer block with (normalized) external context.
    # Flags select the variants: input block (mask + attn output) vs output block
    # (no mask, no attn output, fused final LayerNorm epilogue).
    pos = 0
    mask_ref = None
    if has_mask:
        mask_ref = rest[pos]; pos += 1
    (ln1w, ln1b, lncw, lncb, wq, wkv, wo, ob,
     ln3w, ln3b, fw1, fw2) = rest[pos:pos + 12]
    pos += 12
    if final_ln:
        fng, fnb = rest[pos], rest[pos + 1]
        pos += 2
    xo_ref = rest[pos]
    pos += 1
    attn_ref = rest[pos] if emit_attn else None

    dh = wq.shape[1]
    hd = dh // heads

    x = x_ref[0]                                          # (S, D)
    xn = _layernorm(x, ln1w[...], ln1b[...])
    cn = _layernorm(ctx_ref[0], lncw[...], lncb[...])
    # Fused full-width projections (softmax scale already folded into wq).
    q = _mm(xn, wq[...])                                  # (S, Dh)
    kv = _mm(cn, wkv[...])                                # (C, 2*Dh)
    k = kv[:, :dh]
    v = kv[:, dh:]
    add_mask = None
    if has_mask:
        # additive mask built ONCE (not per head); finite fill avoids NaN on empty rows
        add_mask = jnp.where(mask_ref[0] > 0.0, 0.0, -1e30)   # (1, C)
    parts = []
    for h in range(heads):
        c0 = h * hd
        dots = _mm_nt(q[:, c0:c0 + hd], k[:, c0:c0 + hd])     # (S, C) f32
        if add_mask is not None:
            dots = dots + add_mask
        dots = dots - jnp.max(dots, axis=-1, keepdims=True)
        e = jnp.exp(dots)
        attn = e * pl.reciprocal(jnp.sum(e, axis=-1, keepdims=True), approx=True)
        if emit_attn:
            attn_ref[0, h] = attn
        parts.append(_mm(attn, v[:, c0:c0 + hd]))             # (S, hd)
    y = parts[0] if heads == 1 else jnp.concatenate(parts, axis=-1)   # (S, Dh)
    x2 = x + _mm(y, wo[...]) + ob[...]                    # single fused out-proj + residual
    x3 = _layernorm(x2, ln3w[...], ln3b[...])
    hff = _gelu_exact(_mm(x3, fw1[...]))
    out = x2 + _mm(hff, fw2[...])
    if final_ln:
        out = _layernorm(out, fng[...], fnb[...])         # fused output_norm epilogue
    xo_ref[0] = out


def _block_self_kernel(x_ref, ln1w, ln1b, wq, wkv, wo, ob, ln3w, ln3b, fw1, fw2,
                       xo_ref, rs_ref, *, heads, bt, seq):
    # Full pre-norm self-attention block over a batch tile of Bt elements.
    # Projections / out-proj / FFN run on the flattened (Bt*L, D) slab (lane-dense, big M);
    # only the per-head softmax loops over (batch, head).  Never materializes (H, L, L)
    # to HBM: emits only the per-key attention row-sum (1, L) per batch element.
    d = x_ref.shape[2]
    dh = wq.shape[1]
    hd = dh // heads

    x = x_ref[...]                                        # (Bt, L, D)
    xf = x.reshape(bt * seq, d)
    xn = _layernorm(xf, ln1w[...], ln1b[...])
    q = _mm(xn, wq[...])                                  # (Bt*L, Dh) (scale folded into wq)
    kv = _mm(xn, wkv[...])                                # (Bt*L, 2*Dh)
    k = kv[:, :dh]
    v = kv[:, dh:]

    y_rows = []
    for b in range(bt):
        r0 = b * seq
        qb = q[r0:r0 + seq]
        kb = k[r0:r0 + seq]
        vb = v[r0:r0 + seq]
        rs = jnp.zeros((1, seq), jnp.float32)
        parts = []
        for h in range(heads):
            c0 = h * hd
            dots = _mm_nt(qb[:, c0:c0 + hd], kb[:, c0:c0 + hd])   # (L, L) f32
            dots = dots - jnp.max(dots, axis=-1, keepdims=True)
            e = jnp.exp(dots)
            attn = e * pl.reciprocal(jnp.sum(e, axis=-1, keepdims=True), approx=True)
            rs = rs + jnp.sum(attn, axis=0, keepdims=True)        # sum over heads+queries
            parts.append(_mm(attn, vb[:, c0:c0 + hd]))            # (L, hd)
        rs_ref[b] = rs
        y_rows.append(parts[0] if heads == 1 else jnp.concatenate(parts, axis=-1))
    y = y_rows[0] if bt == 1 else jnp.concatenate(y_rows, axis=0)  # (Bt*L, Dh)

    x2 = xf + _mm(y, wo[...]) + ob[...]
    x3 = _layernorm(x2, ln3w[...], ln3b[...])
    hff = _gelu_exact(_mm(x3, fw1[...]))
    out = x2 + _mm(hff, fw2[...])
    xo_ref[...] = out.reshape(bt, seq, d)


# ----------------------------- Pallas wrappers -----------------------------

def _batch_spec(shape):
    nd = len(shape)
    return pl.BlockSpec(shape, lambda b: (b,) + (0,) * (nd - 1))


def _rep_spec(shape):
    nd = len(shape)
    return pl.BlockSpec(shape, lambda b: (0,) * nd)


def _cparams(dims):
    # Explicit VMEM budget; well under v5e/v6e's 128 MiB and v7x's 64 MiB physical.
    return pltpu.CompilerParams(dimension_semantics=dims,
                                vmem_limit_bytes=64 * 1024 * 1024)


def _pick_bt(batch, seq):
    # Batch tile per grid step; Bt > 1 requires seq to be a sublane-tile multiple so the
    # in-kernel (Bt, L, D) <-> (Bt*L, D) reshapes are free.
    if seq % 8 != 0:
        return 1
    for bt in (8, 4, 2):
        if batch % bt == 0:
            return bt
    return 1


def _attn_weights_bf16(ap):
    # Fold the softmax scale (hd**-0.5) into the Q weights, cast matmul weights to bf16.
    heads = ap['num_heads']
    dh = ap['to_q_w'].shape[1]
    hd = dh // heads
    wq = (ap['to_q_w'] * (float(hd) ** -0.5)).astype(jnp.bfloat16)
    wkv = ap['to_kv_w'].astype(jnp.bfloat16)
    wo = ap['to_out_w'].astype(jnp.bfloat16)
    return heads, dh, wq, wkv, wo, ap['to_out_b']


def fused_block_cross(bp, x, ctx, maskf=None, *, emit_attn=True, final_ln_params=None):
    # x:(B,S,D)  ctx:(B,C,CD)  maskf:(B,1,C) float or None
    # returns x_out:(B,S,D) [, attn:(B,H,S,C) if emit_attn]
    B, S, D = x.shape
    _, C, CD = ctx.shape
    heads, dh, wq, wkv, wo, ob = _attn_weights_bf16(bp['attn'])
    fw1 = bp['ff_w1'].astype(jnp.bfloat16)
    fw2 = bp['ff_w2'].astype(jnp.bfloat16)
    lncw = bp['ln2_w'] if 'ln2_w' in bp else bp['ln1_w']
    lncb = bp['ln2_b'] if 'ln2_b' in bp else bp['ln1_b']

    has_mask = maskf is not None
    final_ln = final_ln_params is not None

    inputs = [x, ctx]
    in_specs = [_batch_spec((1, S, D)), _batch_spec((1, C, CD))]
    if has_mask:
        inputs.append(maskf)
        in_specs.append(_batch_spec((1, 1, C)))
    inputs += [bp['ln1_w'], bp['ln1_b'], lncw, lncb, wq, wkv, wo, ob,
               bp['ln3_w'], bp['ln3_b'], fw1, fw2]
    in_specs += [_rep_spec((1, D)), _rep_spec((1, D)),
                 _rep_spec((1, CD)), _rep_spec((1, CD)),
                 _rep_spec((D, dh)), _rep_spec((CD, 2 * dh)),
                 _rep_spec((dh, D)), _rep_spec((1, D)),
                 _rep_spec((1, D)), _rep_spec((1, D)),
                 _rep_spec((D, 4 * D)), _rep_spec((4 * D, D))]
    if final_ln:
        g, b2 = final_ln_params
        inputs += [g, b2]
        in_specs += [_rep_spec((1, D)), _rep_spec((1, D))]

    if emit_attn:
        out_shape = (jax.ShapeDtypeStruct((B, S, D), jnp.float32),
                     jax.ShapeDtypeStruct((B, heads, S, C), jnp.float32))
        out_specs = (_batch_spec((1, S, D)), _batch_spec((1, heads, S, C)))
    else:
        out_shape = jax.ShapeDtypeStruct((B, S, D), jnp.float32)
        out_specs = _batch_spec((1, S, D))

    return pl.pallas_call(
        functools.partial(_block_cross_kernel, heads=heads, has_mask=has_mask,
                          emit_attn=emit_attn, final_ln=final_ln),
        out_shape=out_shape,
        grid=(B,),
        in_specs=in_specs,
        out_specs=out_specs,
        compiler_params=_cparams(("parallel",)),
    )(*inputs)


def fused_block_self(bp, x):
    # x:(B,L,D)  ->  x_out:(B,L,D), per-key attention row-sum (B,1,L)
    B, L, D = x.shape
    heads, dh, wq, wkv, wo, ob = _attn_weights_bf16(bp['attn'])
    fw1 = bp['ff_w1'].astype(jnp.bfloat16)
    fw2 = bp['ff_w2'].astype(jnp.bfloat16)
    bt = _pick_bt(B, L)
    return pl.pallas_call(
        functools.partial(_block_self_kernel, heads=heads, bt=bt, seq=L),
        out_shape=(jax.ShapeDtypeStruct((B, L, D), jnp.float32),
                   jax.ShapeDtypeStruct((B, 1, L), jnp.float32)),
        grid=(B // bt,),
        in_specs=[pl.BlockSpec((bt, L, D), lambda i: (i, 0, 0)),
                  _rep_spec((1, D)), _rep_spec((1, D)),
                  _rep_spec((D, dh)), _rep_spec((D, 2 * dh)),
                  _rep_spec((dh, D)), _rep_spec((1, D)),
                  _rep_spec((1, D)), _rep_spec((1, D)),
                  _rep_spec((D, 4 * D)), _rep_spec((4 * D, D))],
        out_specs=(pl.BlockSpec((bt, L, D), lambda i: (i, 0, 0)),
                   pl.BlockSpec((bt, 1, L), lambda i: (i, 0, 0))),
        compiler_params=_cparams(("parallel",)),
    )(x, bp['ln1_w'], bp['ln1_b'], wq, wkv, wo, ob,
      bp['ln3_w'], bp['ln3_b'], fw1, fw2)


def pallas_input_stage(x, emb, proj_w_bf16, ln_g, ln_b, w1_bf16, w2_bf16):
    # x:(B,D) (scalar-per-batch path) or (B,L,D) (per-latent path); emb:(L,D) -> (B,L,D)
    per_latent = (x.ndim == 3)
    B = x.shape[0]
    L, D = emb.shape
    bt = _pick_bt(B, L)
    x_spec = (pl.BlockSpec((bt, L, D), lambda i: (i, 0, 0)) if per_latent
              else pl.BlockSpec((bt, D), lambda i: (i, 0)))
    return pl.pallas_call(
        functools.partial(_input_stage_kernel, bt=bt, num_latents=L,
                          per_latent=per_latent),
        out_shape=jax.ShapeDtypeStruct((B, L, D), jnp.float32),
        grid=(B // bt,),
        in_specs=[x_spec,
                  _rep_spec((L, D)),
                  _rep_spec((D, D)),
                  _rep_spec((1, D)), _rep_spec((1, D)),
                  _rep_spec((D, 4 * D)), _rep_spec((4 * D, D))],
        out_specs=pl.BlockSpec((bt, L, D), lambda i: (i, 0, 0)),
        compiler_params=_cparams(("parallel",)),
    )(x, emb, proj_w_bf16, ln_g, ln_b, w1_bf16, w2_bf16)


# ----------------------------- model forward (Pallas path) -----------------------------

def perceiver_forward(params, x, context, context_mask, num_latents, num_queries):
    B, C, _ = context.shape
    D = params['input_embedding'].shape[1]
    L = num_latents

    if x is not None:
        g, bb = params['input_ff_ln']
        latent = pallas_input_stage(
            x, params['input_embedding'],
            params['input_proj_w'].astype(jnp.bfloat16), g, bb,
            params['input_ff_w1'].astype(jnp.bfloat16),
            params['input_ff_w2'].astype(jnp.bfloat16))
    else:
        latent = jnp.broadcast_to(params['input_embedding'][None], (B, L, D))

    maskf = (context_mask.astype(jnp.float32)[:, None, :]
             if context_mask is not None else None)

    latent, input_attn = fused_block_cross(params['input_block'], latent, context, maskf,
                                           emit_attn=True)

    # Self blocks only emit per-key attention row-sums; the shared contraction with
    # input_attn is done once at the end (instead of per block inside the kernel).
    rowsum_total = jnp.zeros((B, 1, L), jnp.float32)
    for bp in params['blocks']:
        latent, rs = fused_block_self(bp, latent)
        rowsum_total = rowsum_total + rs
    attention_maps = jnp.einsum('bl,blc->bc', rowsum_total[:, 0, :], input_attn[:, 0])

    y = jnp.broadcast_to(params['output_embedding'][None], (B, num_queries, D))
    # output block: no mask, no attention output, final output LayerNorm fused in.
    y = fused_block_cross(params['output_block'], y, latent, None,
                          emit_attn=False, final_ln_params=params['output_norm'])
    return y, attention_maps


# ----------------------------- pure-JAX reference (for checking) -----------------------------

def _ref_ln(x, g, b):
    mu = x.mean(-1, keepdims=True)
    var = ((x - mu) ** 2).mean(-1, keepdims=True)
    return (x - mu) / jnp.sqrt(var + 1e-5) * g.reshape(-1) + b.reshape(-1)


def _ref_attention(p, xn, ctxn, mask):
    b, s, d = xn.shape
    _, c, cd = ctxn.shape
    heads = p['num_heads']
    hd = d // heads
    q = (xn @ p['to_q_w']).reshape(b, s, heads, hd).transpose(0, 2, 1, 3)
    kv = (ctxn @ p['to_kv_w']).reshape(b, c, 2, heads, hd)
    k = kv[:, :, 0].transpose(0, 2, 1, 3)
    v = kv[:, :, 1].transpose(0, 2, 1, 3)
    dots = jnp.einsum('bhsd,bhcd->bhsc', q * hd ** -0.5, k)
    if mask is not None:
        dots = jnp.where(mask[:, None, :, :], dots, -jnp.inf)
    attn = jax.nn.softmax(dots, axis=-1)
    y = jnp.einsum('bhsc,bhcd->bhsd', attn, v).transpose(0, 2, 1, 3).reshape(b, s, d)
    return y @ p['to_out_w'] + p['to_out_b'].reshape(-1), attn


def _ref_block(p, x, context, mask):
    xn = _ref_ln(x, p['ln1_w'], p['ln1_b'])
    ctxn = _ref_ln(context, p['ln2_w'], p['ln2_b']) if 'ln2_w' in p else xn
    y, attn = _ref_attention(p['attn'], xn, ctxn, mask)
    x = x + y
    h = _ref_ln(x, p['ln3_w'], p['ln3_b'])
    x = x + jax.nn.gelu(h @ p['ff_w1'], approximate=False) @ p['ff_w2']
    return x, attn


def _ref_perceiver(params, x, context, context_mask, num_latents, num_queries):
    b, c, _ = context.shape
    d = params['input_embedding'].shape[1]
    l = num_latents
    mask = (jnp.broadcast_to(context_mask[:, None, :], (b, l, c))
            if context_mask is not None else None)
    latent = jnp.broadcast_to(params['input_embedding'][None], (b, l, d))
    if x is not None:
        proj = x @ params['input_proj_w']
        latent = latent + (proj[:, None, :] if x.ndim == 2 else proj)
        g, bb = params['input_ff_ln']
        h = _ref_ln(latent, g, bb)
        latent = latent + jax.nn.gelu(h @ params['input_ff_w1'],
                                      approximate=False) @ params['input_ff_w2']
    latent, input_attn = _ref_block(params['input_block'], latent, context, mask)
    amaps = jnp.zeros((b, c), jnp.float32)
    for bp in params['blocks']:
        latent, attn = _ref_block(bp, latent, latent, None)
        amaps = amaps + (attn @ input_attn).sum(axis=(-2, -3))
    y = jnp.broadcast_to(params['output_embedding'][None], (b, num_queries, d))
    y, _ = _ref_block(params['output_block'], y, latent, None)
    g, bb = params['output_norm']
    return _ref_ln(y, g, bb), amaps


# ----------------------------- deterministic parameter init -----------------------------

def init_params(key, model_dim, context_dim, num_latents, num_blocks, num_heads, num_queries):
    d = model_dim
    it = iter(jax.random.split(key, 128))

    def lin(din, dout):  # stored already transposed: (in, out)
        return jax.random.normal(next(it), (din, dout), jnp.float32) * (din ** -0.5)

    def ln(dim):
        return jnp.ones((1, dim), jnp.float32), jnp.zeros((1, dim), jnp.float32)

    def attn_p(ctx_d, heads):
        return dict(num_heads=heads,
                    to_q_w=lin(d, d),
                    to_kv_w=lin(ctx_d, 2 * d),
                    to_out_w=lin(d, d),
                    to_out_b=jax.random.normal(next(it), (1, d), jnp.float32) * 0.02)

    def block_p(ctx_d, heads, extra_ctx_norm):
        p = dict(attn=attn_p(ctx_d, heads), ff_w1=lin(d, 4 * d), ff_w2=lin(4 * d, d))
        p['ln1_w'], p['ln1_b'] = ln(d)
        if extra_ctx_norm:
            p['ln2_w'], p['ln2_b'] = ln(ctx_d)
        p['ln3_w'], p['ln3_b'] = ln(d)
        return p

    return dict(
        input_embedding=jax.random.normal(next(it), (num_latents, d), jnp.float32) * 0.02,
        output_embedding=jax.random.normal(next(it), (num_queries, d), jnp.float32) * 0.02,
        input_proj_w=lin(d, d),
        input_ff_ln=ln(d),
        input_ff_w1=lin(d, 4 * d),
        input_ff_w2=lin(4 * d, d),
        input_block=block_p(context_dim, 1, True),
        output_block=block_p(d, 1, True),
        blocks=[block_p(d, num_heads, False) for _ in range(num_blocks)],
        output_norm=ln(d),
    )


# ----------------------------- main -----------------------------

if __name__ == "__main__":
    model_dim, context_dim = 32, 48
    num_latents, num_blocks, num_heads, num_queries = 8, 2, 8, 1
    batch, context_len = 2, 12

    key = jax.random.PRNGKey(0)
    kp, kx, kc = jax.random.split(key, 3)
    params = init_params(kp, model_dim, context_dim, num_latents,
                         num_blocks, num_heads, num_queries)

    x = jax.random.normal(kx, (batch, model_dim), jnp.float32)             # x.dim() == 2 path
    context = jax.random.normal(kc, (batch, context_len, context_dim), jnp.float32)
    lens = jnp.array([12, 9])
    context_mask = jnp.arange(context_len)[None, :] < lens[:, None]        # (B, C) bool

    y, attention_maps = perceiver_forward(params, x, context, context_mask,
                                          num_latents, num_queries)
    jax.block_until_ready((y, attention_maps))

    y_ref, am_ref = _ref_perceiver(params, x, context, context_mask,
                                   num_latents, num_queries)
    assert y.shape == (batch, num_queries, model_dim)
    assert attention_maps.shape == (batch, context_len)
    # Tolerances account for bf16 MXU inputs / weights vs. the pure-f32 reference
    # (plus the approx EUP reciprocal in the softmax); logic bugs are O(1) off.
    assert bool(jnp.allclose(y, y_ref, atol=1e-1, rtol=1e-1)), "output mismatch"
    assert bool(jnp.allclose(attention_maps, am_ref, atol=2e-1, rtol=1e-1)), "attn-map mismatch"

    print("KERNEL_OK")
</pallas_src>

<mosaic_0001>
module attributes {stable_mosaic.version = 11 : i64} {
  func.func @_input_stage_kernel(%arg0: i32, %arg1: memref<2x32xf32, #tpu.memory_space<vmem>>, %arg2: memref<8x32xf32, #tpu.memory_space<vmem>>, %arg3: memref<32x32xbf16, #tpu.memory_space<vmem>>, %arg4: memref<1x32xf32, #tpu.memory_space<vmem>>, %arg5: memref<1x32xf32, #tpu.memory_space<vmem>>, %arg6: memref<32x128xbf16, #tpu.memory_space<vmem>>, %arg7: memref<128x32xbf16, #tpu.memory_space<vmem>>, %arg8: memref<2x8x32xf32, #tpu.memory_space<vmem>>) attributes {dimension_semantics = [#tpu.dimension_semantics<parallel>], iteration_bounds = array<i64: 1>, scalar_prefetch = 0 : i64, scratch_operands = 0 : i64, tpu.core_type = #tpu.core_type<tc>, window_params = [{transform_indices = @transform_0, window_bounds = array<i64: 2, 32>}, {pipeline_mode = #tpu.pipeline_mode<synchronous>, transform_indices = @transform_1, window_bounds = array<i64: 8, 32>}, {pipeline_mode = #tpu.pipeline_mode<synchronous>, transform_indices = @transform_2, window_bounds = array<i64: 32, 32>}, {pipeline_mode = #tpu.pipeline_mode<synchronous>, transform_indices = @transform_3, window_bounds = array<i64: 1, 32>}, {pipeline_mode = #tpu.pipeline_mode<synchronous>, transform_indices = @transform_4, window_bounds = array<i64: 1, 32>}, {pipeline_mode = #tpu.pipeline_mode<synchronous>, transform_indices = @transform_5, window_bounds = array<i64: 32, 128>}, {pipeline_mode = #tpu.pipeline_mode<synchronous>, transform_indices = @transform_6, window_bounds = array<i64: 128, 32>}, {transform_indices = @transform_7, window_bounds = array<i64: 2, 8, 32>}]} {
    %c0 = arith.constant 0 : index
    %c0_0 = arith.constant 0 : index
    %0 = vector.load %arg2[%c0, %c0_0] : memref<8x32xf32, #tpu.memory_space<vmem>>, vector<8x32xf32>
    %c0_1 = arith.constant 0 : index
    %c0_2 = arith.constant 0 : index
    %1 = vector.load %arg1[%c0_1, %c0_2] : memref<2x32xf32, #tpu.memory_space<vmem>>, vector<2x32xf32>
    %c0_3 = arith.constant 0 : index
    %c0_4 = arith.constant 0 : index
    %2 = vector.load %arg3[%c0_3, %c0_4] : memref<32x32xbf16, #tpu.memory_space<vmem>>, vector<32x32xbf16>
    %3 = arith.truncf %1 : vector<2x32xf32> to vector<2x32xbf16>
    %cst = arith.constant dense<0.000000e+00> : vector<2x32xf32>
    %4 = tpu.matmul %3, %2, %cst {dimension_numbers = #tpu.dot_dimension_numbers<[1], [0], [0], [1], [0, 0, 1, 1], [], []>} : vector<2x32xbf16>, vector<32x32xbf16>, vector<2x32xf32> -> vector<2x32xf32>
    %5 = vector.shape_cast %0 : vector<8x32xf32> to vector<1x8x32xf32>
    %6 = vector.shape_cast %4 : vector<2x32xf32> to vector<2x1x32xf32>
    %7 = vector.broadcast %5 : vector<1x8x32xf32> to vector<2x8x32xf32>
    %8 = vector.broadcast %6 : vector<2x1x32xf32> to vector<2x8x32xf32>
    %9 = arith.addf %7, %8 : vector<2x8x32xf32>
    %10 = vector.shape_cast %9 : vector<2x8x32xf32> to vector<16x32xf32>
    %c0_5 = arith.constant 0 : index
    %c0_6 = arith.constant 0 : index
    %11 = vector.load %arg4[%c0_5, %c0_6] : memref<1x32xf32, #tpu.memory_space<vmem>>, vector<1x32xf32>
    %c0_7 = arith.constant 0 : index
    %c0_8 = arith.constant 0 : index
    %12 = vector.load %arg5[%c0_7, %c0_8] : memref<1x32xf32, #tpu.memory_space<vmem>>, vector<1x32xf32>
    %cst_9 = arith.constant dense<0.000000e+00> : vector<16xf32>
    %13 = vector.multi_reduction <add>, %10, %cst_9 [1] : vector<16x32xf32> to vector<16xf32>
    %14 = vector.shape_cast %13 : vector<16xf32> to vector<16x1xf32>
    %cst_10 = arith.constant 3.200000e+01 : f32
    %15 = vector.broadcast %cst_10 : f32 to vector<16x1xf32>
    %16 = arith.divf %14, %15 : vector<16x1xf32>
    %17 = vector.broadcast %16 : vector<16x1xf32> to vector<16x32xf32>
    %18 = arith.subf %10, %17 : vector<16x32xf32>
    %19 = arith.mulf %18, %18 : vector<16x32xf32>
    %cst_11 = arith.constant dense<0.000000e+00> : vector<16xf32>
    %20 = vector.multi_reduction <add>, %19, %cst_11 [1] : vector<16x32xf32> to vector<16xf32>
    %21 = vector.shape_cast %20 : vector<16xf32> to vector<16x1xf32>
    %cst_12 = arith.constant 3.200000e+01 : f32
    %22 = vector.broadcast %cst_12 : f32 to vector<16x1xf32>
    %23 = arith.divf %21, %22 : vector<16x1xf32>
    %24 = vector.broadcast %16 : vector<16x1xf32> to vector<16x32xf32>
    %25 = arith.subf %10, %24 : vector<16x32xf32>
    %cst_13 = arith.constant 9.99999974E-6 : f32
    %26 = vector.broadcast %cst_13 : f32 to vector<16x1xf32>
    %27 = arith.addf %23, %26 : vector<16x1xf32>
    %28 = math.rsqrt %27 : vector<16x1xf32>
    %29 = vector.broadcast %28 : vector<16x1xf32> to vector<16x32xf32>
    %30 = arith.mulf %25, %29 : vector<16x32xf32>
    %31 = vector.broadcast %11 : vector<1x32xf32> to vector<16x32xf32>
    %32 = arith.mulf %30, %31 : vector<16x32xf32>
    %33 = vector.broadcast %12 : vector<1x32xf32> to vector<16x32xf32>
    %34 = arith.addf %32, %33 : vector<16x32xf32>
    %c0_14 = arith.constant 0 : index
    %c0_15 = arith.constant 0 : index
    %35 = vector.load %arg6[%c0_14, %c0_15] : memref<32x128xbf16, #tpu.memory_space<vmem>>, vector<32x128xbf16>
    %36 = arith.truncf %34 : vector<16x32xf32> to vector<16x32xbf16>
    %cst_16 = arith.constant dense<0.000000e+00> : vector<16x128xf32>
    %37 = tpu.matmul %36, %35, %cst_16 {dimension_numbers = #tpu.dot_dimension_numbers<[1], [0], [0], [1], [0, 0, 1, 1], [], []>} : vector<16x32xbf16>, vector<32x128xbf16>, vector<16x128xf32> -> vector<16x128xf32>
    %cst_17 = arith.constant 5.000000e-01 : f32
    %38 = vector.broadcast %cst_17 : f32 to vector<16x128xf32>
    %39 = arith.mulf %38, %37 : vector<16x128xf32>
    %cst_18 = arith.constant 0.707106769 : f32
    %40 = vector.broadcast %cst_18 : f32 to vector<16x128xf32>
    %41 = arith.mulf %37, %40 : vector<16x128xf32>
    %cst_19 = arith.constant 0.000000e+00 : f32
    %42 = vector.broadcast %cst_19 : f32 to vector<16x128xf32>
    %43 = arith.cmpf oge, %41, %42 : vector<16x128xf32>
    %cst_20 = arith.constant 1.000000e+00 : f32
    %cst_21 = arith.constant -1.000000e+00 : f32
    %44 = vector.broadcast %cst_20 : f32 to vector<16x128xf32>
    %45 = vector.broadcast %cst_21 : f32 to vector<16x128xf32>
    %46 = arith.select %43, %44, %45 : vector<16x128xi1>, vector<16x128xf32>
    %47 = math.absf %41 : vector<16x128xf32>
    %cst_22 = arith.constant 0.327591091 : f32
    %48 = vector.broadcast %cst_22 : f32 to vector<16x128xf32>
    %49 = arith.mulf %48, %47 : vector<16x128xf32>
    %cst_23 = arith.constant 1.000000e+00 : f32
    %50 = vector.broadcast %cst_23 : f32 to vector<16x128xf32>
    %51 = arith.addf %50, %49 : vector<16x128xf32>
    %cst_24 = arith.constant 1.000000e+00 : f32
    %52 = vector.broadcast %cst_24 : f32 to vector<16x128xf32>
    %53 = arith.divf %52, %51 : vector<16x128xf32>
    %cst_25 = arith.constant 1.06140542 : f32
    %54 = vector.broadcast %cst_25 : f32 to vector<16x128xf32>
    %55 = arith.mulf %54, %53 : vector<16x128xf32>
    %cst_26 = arith.constant -1.45315206 : f32
    %56 = vector.broadcast %cst_26 : f32 to vector<16x128xf32>
    %57 = arith.addf %55, %56 : vector<16x128xf32>
    %58 = arith.mulf %57, %53 : vector<16x128xf32>
    %cst_27 = arith.constant 1.42141378 : f32
    %59 = vector.broadcast %cst_27 : f32 to vector<16x128xf32>
    %60 = arith.addf %58, %59 : vector<16x128xf32>
    %61 = arith.mulf %60, %53 : vector<16x128xf32>
    %cst_28 = arith.constant -0.284496725 : f32
    %62 = vector.broadcast %cst_28 : f32 to vector<16x128xf32>
    %63 = arith.addf %61, %62 : vector<16x128xf32>
    %64 = arith.mulf %63, %53 : vector<16x128xf32>
    %cst_29 = arith.constant 0.254829586 : f32
    %65 = vector.broadcast %cst_29 : f32 to vector<16x128xf32>
    %66 = arith.addf %64, %65 : vector<16x128xf32>
    %67 = arith.mulf %66, %53 : vector<16x128xf32>
    %cst_30 = arith.constant 0.000000e+00 : f32
    %68 = vector.broadcast %cst_30 : f32 to vector<16x128xf32>
    %69 = arith.subf %68, %47 : vector<16x128xf32>
    %70 = arith.mulf %69, %47 : vector<16x128xf32>
    %71 = math.exp %70 : vector<16x128xf32>
    %72 = arith.mulf %67, %71 : vector<16x128xf32>
    %cst_31 = arith.constant 1.000000e+00 : f32
    %73 = vector.broadcast %cst_31 : f32 to vector<16x128xf32>
    %74 = arith.subf %73, %72 : vector<16x128xf32>
    %75 = arith.mulf %46, %74 : vector<16x128xf32>
    %cst_32 = arith.constant 1.000000e+00 : f32
    %76 = vector.broadcast %cst_32 : f32 to vector<16x128xf32>
    %77 = arith.addf %76, %75 : vector<16x128xf32>
    %78 = arith.mulf %39, %77 : vector<16x128xf32>
    %c0_33 = arith.constant 0 : index
    %c0_34 = arith.constant 0 : index
    %79 = vector.load %arg7[%c0_33, %c0_34] : memref<128x32xbf16, #tpu.memory_space<vmem>>, vector<128x32xbf16>
    %80 = arith.truncf %78 : vector<16x128xf32> to vector<16x128xbf16>
    %cst_35 = arith.constant dense<0.000000e+00> : vector<16x32xf32>
    %81 = tpu.matmul %80, %79, %cst_35 {dimension_numbers = #tpu.dot_dimension_numbers<[1], [0], [0], [1], [0, 0, 1, 1], [], []>} : vector<16x128xbf16>, vector<128x32xbf16>, vector<16x32xf32> -> vector<16x32xf32>
    %82 = arith.addf %10, %81 : vector<16x32xf32>
    %83 = vector.shape_cast %82 : vector<16x32xf32> to vector<2x8x32xf32>
    %c0_36 = arith.constant 0 : index
    %c0_37 = arith.constant 0 : index
    %c0_38 = arith.constant 0 : index
    %84 = vector.load %arg8[%c0_36, %c0_37, %c0_38] : memref<2x8x32xf32, #tpu.memory_space<vmem>>, vector<2x8x32xf32>
    tpu.vector_store %arg8[%c0_36, %c0_37, %c0_38], %83 {strides = array<i32>} : memref<2x8x32xf32, #tpu.memory_space<vmem>>, vector<2x8x32xf32>,
    return
  }
  func.func @transform_0(%arg0: i32) -> (i32, i32) {
    %c0_i32 = arith.constant 0 : i32
    %c0_i32_0 = arith.constant 0 : i32
    return %arg0, %c0_i32 : i32, i32
  }
  func.func @transform_1(%arg0: i32) -> (i32, i32) {
    %c0_i32 = arith.constant 0 : i32
    %c0_i32_0 = arith.constant 0 : i32
    %c0_i32_1 = arith.constant 0 : i32
    return %c0_i32, %c0_i32_0 : i32, i32
  }
  func.func @transform_2(%arg0: i32) -> (i32, i32) {
    %c0_i32 = arith.constant 0 : i32
    %c0_i32_0 = arith.constant 0 : i32
    %c0_i32_1 = arith.constant 0 : i32
    return %c0_i32, %c0_i32_0 : i32, i32
  }
  func.func @transform_3(%arg0: i32) -> (i32, i32) {
    %c0_i32 = arith.constant 0 : i32
    %c0_i32_0 = arith.constant 0 : i32
    %c0_i32_1 = arith.constant 0 : i32
    return %c0_i32, %c0_i32_0 : i32, i32
  }
  func.func @transform_4(%arg0: i32) -> (i32, i32) {
    %c0_i32 = arith.constant 0 : i32
    %c0_i32_0 = arith.constant 0 : i32
    %c0_i32_1 = arith.constant 0 : i32
    return %c0_i32, %c0_i32_0 : i32, i32
  }
  func.func @transform_5(%arg0: i32) -> (i32, i32) {
    %c0_i32 = arith.constant 0 : i32
    %c0_i32_0 = arith.constant 0 : i32
    %c0_i32_1 = arith.constant 0 : i32
    return %c0_i32, %c0_i32_0 : i32, i32
  }
  func.func @transform_6(%arg0: i32) -> (i32, i32) {
    %c0_i32 = arith.constant 0 : i32
    %c0_i32_0 = arith.constant 0 : i32
    %c0_i32_1 = arith.constant 0 : i32
    return %c0_i32, %c0_i32_0 : i32, i32
  }
  func.func @transform_7(%arg0: i32) -> (i32, i32, i32) {
    %c0_i32 = arith.constant 0 : i32
    %c0_i32_0 = arith.constant 0 : i32
    %c0_i32_1 = arith.constant 0 : i32
    return %arg0, %c0_i32, %c0_i32_0 : i32, i32, i32
  }
}

</mosaic_0001>

<bundles_post_ra>
// kernel: tpu_custom_call.1
= control target key start
LH: loop header
LB: loop body
LE: loop exit
PB: predicated region body
PF: predicated region fallthrough
CT: control target
= control target key end

     0   :  { %s589_s0 = inlined_call_operand.vmem [shape: f32[2,32], index: 0, kind: input, shape index: {}]   ;;  %s590_s1 = inlined_call_operand.vmem [shape: f32[8,32], index: 1, kind: input, shape index: {}]   ;;  %s591_s2 = inlined_call_operand.vmem [shape: bf16[32,32], index: 2, kind: input, shape index: {}]   ;;  %s592_s3 = inlined_call_operand.vmem [shape: f32[1,32], index: 3, kind: input, shape index: {}]   ;;  %s593_s4 = inlined_call_operand.vmem [shape: f32[1,32], index: 4, kind: input, shape index: {}]   ;;  %s594_s5 = inlined_call_operand.vmem [shape: bf16[32,128], index: 5, kind: input, shape index: {}]   ;;  %s595_s6 = inlined_call_operand.vmem [shape: bf16[128,32], index: 6, kind: input, shape index: {}]   ;;  %s596_s7 = inlined_call_operand.hbm [shape: f32[2,8,32], index: 7, kind: output, shape index: {}]  }
   0x1   :  { %v401_v0 = vld [vmem:[%s591_s2 + $0x8] sm:$0xff]  ;;  %v400_v1 = vld [vmem:[%s591_s2] sm:$0xff] }
   0x2   :  { %57 = vmatpush.bf16.msra.mxu0 %v401_v0  ;;  %v29_v2 = vld [vmem:[%s589_s0] sm:$0x3] }
   0x3   :  { %12 = vsyncpa [#allocation3], 0  ;;  %v34_v3 = vpack.c.bf16 %v29_v2, %v29_v2  ;;  %vm47_vm0 = vcmask 261120   ;;  %v28_v4 = vld [vmem:[%s590_s1] sm:$0xff]  ;;  %v459_v14 = vmov 32.0   ;;  %v403_v31 = vld [vmem:[%s594_s5 + $0x8] sm:$0xff] }
   0x4   :  { %419 = vrcp.f32 %v459_v14  ;;  %161 = vmatpush.bf16.msra.mxu1 %v403_v31  ;;  %v402_v33 = vld [vmem:[%s594_s5] sm:$0xff]  ;;  %v411_v0 = vld [vmem:[%s595_s6 + $0x38] sm:$0xff]  ;;  %s338_s30 = sshll.u32 %s596_s7, 4  ;;  %s462_s8 = smov 128   ;;  %s339_s30 = int_to_ptr.hbm [resolvable:$true] %s338_s30 }
   0x5   :  { %v417_v52 = vld [vmem:[%s592_s3] ss:$0 sm:$0xff]  ;;  %314 = vmatpush.bf16.msra.mxu2 %v411_v0  ;;  %s463_s0 = smov 8  }
   0x6   :  { %58 = vmatpush.bf16.msra.mxu0 %v400_v1  ;;  %v418_v57 = vld [vmem:[%s593_s4] ss:$0 sm:$0xff] }
   0x8   :  { %162 = vmatpush.bf16.msra.mxu1 %v402_v33 }
   0x9   :  { %358 = vmatmul.msk.bf16.vlgmr.msra.gmra.mxu0 %vm47_vm0, %v34_v3  ;;  %v410_v3 = vld [vmem:[%s595_s6 + $0x30] sm:$0xff] }
   0xa   :  { %v420_v15 = vpop.eup %419  ;;  %315 = vmatpush.bf16.msra.mxu2 %v410_v3 }
   0xb   :  { %v81_v16 = vmul.f32 32.0, %v420_v15  ;;  %vm85_vm1 = vweird.f32 %v420_v15 }
   0xd   :  { %v82_v17 = vsub.f32 1.0, %v81_v16  ;;  %v407_v16 = vld [vmem:[%s595_s6 + $0x18] sm:$0xff] }
   0xf   :  { %v83_v18 = vmul.f32 %v420_v15, %v82_v17 }
  0x11   :  { %v84_v19 = vadd.f32 %v420_v15, %v83_v18 }
  0x13   :  { %v86_v20 = vsel %vm85_vm1, %v420_v15, %v84_v19 }
  0x86   :  { %v60_v5 = vpop.f32.mrf.mxu0 }
  0x87   :  { %v65_v6 = vrot.slane %v60_v5, 1  ;;  %v66_v7 = vperm.slane %v60_v5, 0 }
  0x89   :  { %v517_v8 = vadd.f32 %v66_v7, %v28_v4  ;;  %v67_v9 = vperm.slane %v65_v6, 0  ;;  %v409_v6 = vld [vmem:[%s595_s6 + $0x28] sm:$0xff] }
  0x8a   :  { %316 = vmatpush.bf16.msra.mxu2 %v409_v6 }
  0x8b   :  { %v74_v10 = vsel %vm47_vm0, %v517_v8, 0.0  ;;  %v521_v12 = vadd.f32 %v67_v9, %v28_v4 }
  0x8c   :  { %75 = vadd.xlane.f32.xlu0 %v74_v10  ;;  %v408_v10 = vld [vmem:[%s595_s6 + $0x20] sm:$0xff] }
  0x8d   :  { %v77_v13 = vsel %vm47_vm0, %v521_v12, 0.0 }
  0x8e   :  { %v62_v11 = vpop.f32.mrf.mxu0  ;;  %317 = vmatpush.bf16.msra.mxu2 %v408_v10 }
  0x92   :  { %318 = vmatpush.bf16.msra.mxu2 %v407_v16 }
  0x94   :  { %78 = vadd.xlane.f32.xlu0 %v77_v13 }
  0xff   :  { %v76_v21 = vpop.xlane.xlu0 %75 }
 0x100   :  { %v87_v22 = vmul.f32 %v86_v20, %v76_v21  ;;  %v406_v21 = vld [vmem:[%s595_s6 + $0x10] sm:$0xff] }
 0x101   :  { %319 = vmatpush.bf16.msra.mxu2 %v406_v21 }
 0x102   :  { %v89_v23 = vsub.f32 %v517_v8, %v87_v22 }
 0x104   :  { %v91_v24 = vmul.f32 %v89_v23, %v89_v23 }
 0x106   :  { %v93_v25 = vsel %vm47_vm0, %v91_v24, 0.0 }
 0x107   :  { %94 = vadd.xlane.f32.xlu1 %v93_v25  ;;  %v79_v26 = vpop.xlane.xlu0 %78 }
 0x108   :  { %v88_v27 = vmul.f32 %v86_v20, %v79_v26 }
 0x10a   :  { %v90_v28 = vsub.f32 %v521_v12, %v88_v27  ;;  %v405_v27 = vld [vmem:[%s595_s6 + $0x8] sm:$0xff] }
 0x10b   :  { %320 = vmatpush.bf16.msra.mxu2 %v405_v27 }
 0x10c   :  { %v92_v29 = vmul.f32 %v90_v28, %v90_v28 }
 0x10e   :  { %v96_v30 = vsel %vm47_vm0, %v92_v29, 0.0 }
 0x10f   :  { %97 = vadd.xlane.f32.xlu1 %v96_v30 }
 0x17a   :  { %v95_v32 = vpop.xlane.xlu1 %94 }
 0x17b   :  { %v99_v34 = vmul.f32 %v95_v32, %v86_v20 }
 0x17d   :  { %v101_v35 = vadd.f32 1e-05, %v99_v34 }
 0x17f   :  { %421 = vrsqrt.f32 %v101_v35  ;;  %vm109_vm3 = vweird.f32 %v101_v35 }
 0x182   :  { %v98_v36 = vpop.xlane.xlu1 %97 }
 0x183   :  { %v100_v37 = vmul.f32 %v98_v36, %v86_v20  ;;  %v404_v36 = vld [vmem:[%s595_s6] sm:$0xff]  ;;  %s461_s6 = smov [#allocation2]  }
 0x184   :  { %321 = vmatpush.bf16.msra.mxu2 %v404_v36  ;;  %s336_s27 = sshll.u32 %s461_s6, 4  ;;  %s337_s27 = int_to_ptr.vmem [resolvable:$true] %s336_s27 }
 0x185   :  { %v422_v38 = vpop.eup %421  ;;  %v102_v39 = vadd.f32 1e-05, %v100_v37 }
 0x186   :  { %v104_v40 = vmul.f32 %v422_v38, %v101_v35  ;;  %vm110_vm2 = vweird.f32 %v422_v38 }
 0x187   :  { %423 = vrsqrt.f32 %v102_v39  ;;  %vm111_vm4 = vmor %vm109_vm3, %vm110_vm2  ;;  %vm119_vm6 = vweird.f32 %v102_v39 }
 0x188   :  { %v105_v41 = vmul.f32 %v422_v38, %v104_v40 }
 0x18a   :  { %v106_v42 = vmul.f32 0.5, %v105_v41 }
 0x18c   :  { %v107_v43 = vsub.f32 1.5, %v106_v42 }
 0x18d   :  { %v424_v44 = vpop.eup %423 }
 0x18e   :  { %v108_v45 = vmul.f32 %v422_v38, %v107_v43  ;;  %v114_v46 = vmul.f32 %v424_v44, %v102_v39  ;;  %vm120_vm5 = vweird.f32 %v424_v44 }
 0x18f   :  { %vm121_vm7 = vmor %vm119_vm6, %vm120_vm5 }
 0x190   :  { %v115_v47 = vmul.f32 %v424_v44, %v114_v46  ;;  %v112_v48 = vsel %vm111_vm4, %v422_v38, %v108_v45 }
 0x191   :  { %v123_v51 = vmul.f32 %v112_v48, %v89_v23 }
 0x192   :  { %v116_v49 = vmul.f32 0.5, %v115_v47 }
 0x193   :  { %v128_v56 = vmul.f32 %v417_v52, %v123_v51 }
 0x194   :  { %v117_v50 = vsub.f32 1.5, %v116_v49 }
 0x195   :  { %v133_v59 = vadd.f32 %v418_v57, %v128_v56 }
 0x196   :  { %v118_v53 = vmul.f32 %v424_v44, %v117_v50 }
 0x198   :  { %v122_v54 = vsel %vm121_vm7, %v424_v44, %v118_v53 }
 0x199   :  { %v124_v55 = vmul.f32 %v122_v54, %v90_v28 }
 0x19b   :  { %v129_v58 = vmul.f32 %v417_v52, %v124_v55 }
 0x19d   :  { %v134_v60 = vadd.f32 %v418_v57, %v129_v58 }
 0x19f   :  { %v139_v61 = vpack.c.bf16 %v134_v60, %v133_v59 }
 0x1a1   :  { %367 = vmatmul.msk.bf16.vlgmr.msra.gmra.mxu1 %vm47_vm0, %v139_v61 }
 0x21e   :  { %v542_v62 = vpop.f32.mrf.mxu1 }
 0x21f   :  { %v545_v63 = vmul.f32 0.70710677, %v542_v62  ;;  %v169_v16 = vmul.f32 0.5, %v542_v62 }
 0x221   :  { %v177_v1 = vand.u32 2147483647, %v545_v63  ;;  %vm173_vm1 = vcmp.ge.f32.partialorder %v545_v63, 0.0 }
 0x223   :  { %v179_v2 = vmul.f32 0.3275911, %v177_v1  ;;  %v231_v29 = vsub.f32 0.0, %v177_v1 }
 0x225   :  { %v181_v4 = vadd.f32 1.0, %v179_v2  ;;  %v233_v37 = vmul.f32 %v231_v29, %v177_v1 }
 0x226   :  { %v554_v5 = vpop.f32.mrf.mxu1 }
 0x227   :  { %425 = vrcp.f32 %v181_v4  ;;  %v560_v7 = vmul.f32 0.70710677, %v554_v5  ;;  %v194_v18 = vand.u32 2147483648, %v181_v4  ;;  %v192_v20 = vand.u32 2147483647, %v181_v4 }
 0x228   :  { %vm188_vm9 = vweird.f32 %v181_v4  ;;  %v235_v43 = vmul.f32 1.442695, %v233_v37 }
 0x229   :  { %v178_v9 = vand.u32 2147483647, %v560_v7  ;;  %v195_v23 = vor.u32 1.1754944e-38, %v194_v18  ;;  %vm193_vm11 = vcmp.eq.f32.partialorder %v192_v20, 8.507059e+37  ;;  %vm174_vm2 = vcmp.ge.f32.partialorder %v560_v7, 0.0 }
 0x22b   :  { %v180_v11 = vmul.f32 0.3275911, %v178_v9  ;;  %v232_v45 = vsub.f32 0.0, %v178_v9 }
 0x22d   :  { %v426_v13 = vpop.eup %425  ;;  %v182_v15 = vadd.f32 1.0, %v180_v11  ;;  %v234_v50 = vmul.f32 %v232_v45, %v178_v9 }
 0x22e   :  { %v184_v14 = vmul.f32 %v426_v13, %v181_v4  ;;  %vm189_vm8 = vweird.f32 %v426_v13  ;;  %v460_v4 = vmov -1.0  }
 0x22f   :  { %427 = vrcp.f32 %v182_v15  ;;  %vm190_vm10 = vmor %vm188_vm9, %vm189_vm8  ;;  %v209_v32 = vand.u32 2147483648, %v182_v15  ;;  %v207_v35 = vand.u32 2147483647, %v182_v15  ;;  %vm203_vm13 = vweird.f32 %v182_v15 }
 0x230   :  { %v185_v17 = vsub.f32 1.0, %v184_v14  ;;  %429 = vpow2.f32 %v235_v43  ;;  %v237_v55 = vmul.f32 1.442695, %v234_v50  ;;  %v175_v6 = vsel %vm173_vm1, 1.0, %v460_v4 }
 0x231   :  { %v210_v40 = vor.u32 1.1754944e-38, %v209_v32  ;;  %vm208_vm15 = vcmp.eq.f32.partialorder %v207_v35, 8.507059e+37 }
 0x232   :  { %v186_v19 = vmul.f32 %v426_v13, %v185_v17  ;;  %431 = vpow2.f32 %v237_v55  ;;  %v170_v17 = vmul.f32 0.5, %v554_v5 }
 0x234   :  { %v187_v22 = vadd.f32 %v426_v13, %v186_v19 }
 0x235   :  { %v428_v24 = vpop.eup %427 }
 0x236   :  { %v191_v25 = vsel %vm190_vm10, %v426_v13, %v187_v22  ;;  %v199_v26 = vmul.f32 %v428_v24, %v182_v15  ;;  %vm204_vm12 = vweird.f32 %v428_v24  ;;  %v430_v58 = vpop.eup %429  ;;  %v176_v13 = vsel %vm174_vm2, 1.0, %v460_v4 }
 0x237   :  { %v196_v28 = vsel %vm193_vm11, %v195_v23, %v191_v25  ;;  %vm205_vm14 = vmor %vm203_vm13, %vm204_vm12 }
 0x238   :  { %v213_v30 = vmul.f32 1.0614054, %v196_v28  ;;  %v200_v31 = vsub.f32 1.0, %v199_v26  ;;  %v432_v3 = vpop.eup %431 }
 0x23a   :  { %v215_v33 = vadd.f32 -1.4531521, %v213_v30  ;;  %v201_v34 = vmul.f32 %v428_v24, %v200_v31 }
 0x23c   :  { %v217_v38 = vmul.f32 %v215_v33, %v196_v28  ;;  %v202_v39 = vadd.f32 %v428_v24, %v201_v34 }
 0x23e   :  { %v219_v41 = vadd.f32 1.4214138, %v217_v38  ;;  %v206_v42 = vsel %vm205_vm14, %v428_v24, %v202_v39 }
 0x23f   :  { %v211_v44 = vsel %vm208_vm15, %v210_v40, %v206_v42 }
 0x240   :  { %v221_v46 = vmul.f32 %v219_v41, %v196_v28  ;;  %v214_v47 = vmul.f32 1.0614054, %v211_v44 }
 0x242   :  { %v223_v48 = vadd.f32 -0.28449672, %v221_v46  ;;  %v216_v49 = vadd.f32 -1.4531521, %v214_v47 }
 0x244   :  { %v225_v51 = vmul.f32 %v223_v48, %v196_v28  ;;  %v218_v52 = vmul.f32 %v216_v49, %v211_v44 }
 0x246   :  { %v227_v53 = vadd.f32 0.2548296, %v225_v51  ;;  %v220_v54 = vadd.f32 1.4214138, %v218_v52 }
 0x248   :  { %v229_v56 = vmul.f32 %v227_v53, %v196_v28  ;;  %v222_v57 = vmul.f32 %v220_v54, %v211_v44 }
 0x24a   :  { %v224_v59 = vadd.f32 -0.28449672, %v222_v57  ;;  %v239_v60 = vmul.f32 %v430_v58, %v229_v56 }
 0x24c   :  { %v226_v61 = vmul.f32 %v224_v59, %v211_v44  ;;  %v241_v1 = vsub.f32 1.0, %v239_v60 }
 0x24e   :  { %v228_v0 = vadd.f32 0.2548296, %v226_v61  ;;  %v243_v10 = vmul.f32 %v241_v1, %v175_v6 }
 0x250   :  { %v230_v2 = vmul.f32 %v228_v0, %v211_v44  ;;  %v245_v15 = vadd.f32 1.0, %v243_v10 }
 0x252   :  { %v240_v9 = vmul.f32 %v432_v3, %v230_v2  ;;  %v247_v19 = vmul.f32 %v245_v15, %v169_v16 }
 0x254   :  { %v242_v11 = vsub.f32 1.0, %v240_v9 }
 0x256   :  { %v244_v14 = vmul.f32 %v242_v11, %v176_v13 }
 0x258   :  { %v246_v18 = vadd.f32 1.0, %v244_v14 }
 0x25a   :  { %v248_v63 = vmul.f32 %v246_v18, %v170_v17 }
 0x25c   :  { %v265_v20 = vpack.c.bf16 %v248_v63, %v247_v19 }
 0x25e   :  { %322 = vmatmul.bf16.vlgmr.msra.gmra.mxu2 %v265_v20 }
 0x2e1   :  { %v323_v21 = vpop.f32.mrf.mxu2 }
 0x2e2   :  { %v328_v22 = vadd.f32 %v323_v21, %v517_v8 }
 0x2e4   :  { %330 = vst.msk [vmem:[#allocation2] sm:$0xff] %vm47_vm0, %v328_v22 }
 0x2e9   :  { %v325_v7 = vpop.f32.mrf.mxu2 }
 0x2ea   :  { %v329_v62 = vadd.f32 %v325_v7, %v521_v12 }
 0x2ec   :  { %331 = vst.msk [vmem:[#allocation2 + $0x8] sm:$0xff] %vm47_vm0, %v329_v62 }
 0x2ed   :  { %344 = dma.vmem_to_hbm [thread:$0]  %s337_s27, 256, %s339_s30, [#allocation3], %s462_s8, %s462_s8, %s463_s0  }
 0x2ee   :  { %457 = dma.done.wait [#allocation3], 256  }
 0x2ef   :  { %458 = vsyncadd [#allocation3], 4294967040 }
 0x2f0   :  { %349 = vsyncpa [#allocation3], 1 }

</bundles_post_ra>
